<compile_context>
chip_gen: v5e
topology: v5e:2x2
jax: 0.10.0
libtpu: 0.0.40
codegen_flags: <defaults>
</compile_context>

<pallas_src>
import numpy as np
import jax
import jax.numpy as jnp
from jax import lax
from jax.experimental import pallas as pl
from jax.experimental.pallas import tpu as pltpu


def _round_up(x: int, m: int) -> int:
    return ((x + m - 1) // m) * m


def _unembed_kernel(x_ref, w_ref, b_ref, o_ref):
    # x_ref: (tile_m, d_model)  activation row tile (resident across inner vocab loop)
    # w_ref: (tile_v, d_model)  vocab tile of W_U (streamed)
    # b_ref: (1, tile_v)        vocab tile of b_U (lane-aligned)
    # o_ref: (tile_m, tile_v)
    logits = lax.dot_general(
        x_ref[...], w_ref[...],
        dimension_numbers=(((1,), (1,)), ((), ())),  # contract on d_model, no transpose
        preferred_element_type=jnp.float32)
    o_ref[...] = (logits + b_ref[...]).astype(o_ref.dtype)


def _pick_tile_m(M: int, d_model: int, tile_v: int,
                 x_bytes: int, w_bytes: int, b_bytes: int, out_bytes: int,
                 budget: int) -> int:
    """Largest sublane-aligned M tile whose double-buffered working set fits."""
    m_cap = _round_up(max(M, 1), 8)
    candidates = sorted({8, 16, 32, 64, 128, 256, 512, 1024, 2048, m_cap},
                        reverse=True)
    for tm in candidates:
        if tm > m_cap:
            continue
        need = 2 * (tm * d_model * x_bytes
                    + tile_v * d_model * w_bytes
                    + tile_v * b_bytes
                    + tm * tile_v * out_bytes)
        if need <= budget:
            return tm
    return 8


def unembed(tokens: jax.Array, W_U: jax.Array, b_U: jax.Array,
            *, tile_m: int | None = None, tile_v: int = 512,
            out_dtype=jnp.float32,
            vmem_budget_bytes: int = 40 << 20) -> jax.Array:
    """tokens: (B, P, d_model), W_U: (d_vocab, d_model), b_U: (d_vocab,)
    returns logits: (B, P, d_vocab) in `out_dtype` (default float32)."""
    B, P, d_model = tokens.shape
    d_vocab = W_U.shape[0]
    assert W_U.shape == (d_vocab, d_model)
    assert b_U.shape == (d_vocab,)

    M = B * P
    x2d = tokens.reshape(M, d_model)

    x_bytes = x2d.dtype.itemsize
    w_bytes = W_U.dtype.itemsize
    b_bytes = b_U.dtype.itemsize
    out_bytes = np.dtype(out_dtype).itemsize

    # ---- tile selection (lane/sublane aligned, VMEM-budget aware) ---------
    tile_v = min(tile_v, _round_up(d_vocab, 128))           # lane granularity
    if tile_m is None:
        tile_m = _pick_tile_m(M, d_model, tile_v,
                              x_bytes, w_bytes, b_bytes, out_bytes,
                              vmem_budget_bytes)
    tile_m = min(tile_m, _round_up(M, 8))                    # sublane granularity

    M_pad = _round_up(M, tile_m)
    V_pad = _round_up(d_vocab, tile_v)

    if M_pad != M:
        x2d = jnp.pad(x2d, ((0, M_pad - M), (0, 0)))
    W = W_U
    b2d = b_U.reshape(1, d_vocab)
    if V_pad != d_vocab:
        W = jnp.pad(W, ((0, V_pad - d_vocab), (0, 0)))
        b2d = jnp.pad(b2d, ((0, 0), (0, V_pad - d_vocab)))

    # M outer, vocab inner: the x row tile is fetched once per i and stays
    # resident; only W_U (the big operand) streams. Both axes are independent.
    grid = (M_pad // tile_m, V_pad // tile_v)

    # ---- VMEM limit (double-buffered tiles), under v7x 64 MiB physical ----
    vmem_need = 2 * (tile_m * d_model * x_bytes
                     + tile_v * d_model * w_bytes
                     + tile_v * b_bytes
                     + tile_m * tile_v * out_bytes)
    vmem_limit = int(min(max(vmem_need + (4 << 20), 16 << 20), 48 << 20))

    cost = pl.CostEstimate(
        flops=2 * M * d_model * d_vocab,
        transcendentals=0,
        bytes_accessed=(M * d_model * x_bytes
                        + d_vocab * d_model * w_bytes
                        + d_vocab * b_bytes
                        + M * d_vocab * out_bytes))

    out2d = pl.pallas_call(
        _unembed_kernel,
        out_shape=jax.ShapeDtypeStruct((M_pad, V_pad), out_dtype),
        grid_spec=pltpu.PrefetchScalarGridSpec(
            num_scalar_prefetch=0,
            grid=grid,
            in_specs=[
                # activation row tile: constant across inner vocab axis
                pl.BlockSpec((tile_m, d_model), lambda i, j: (i, 0)),
                # W_U vocab tile, full d_model (contracted in-kernel, no transpose)
                pl.BlockSpec((tile_v, d_model), lambda i, j: (j, 0)),
                # bias tile, already lane-aligned as (1, tile_v)
                pl.BlockSpec((1, tile_v), lambda i, j: (0, j)),
            ],
            out_specs=pl.BlockSpec((tile_m, tile_v), lambda i, j: (i, j)),
        ),
        compiler_params=pltpu.CompilerParams(
            dimension_semantics=("parallel", "parallel"),
            vmem_limit_bytes=vmem_limit),
        cost_estimate=cost,
    )(x2d, W, b2d)

    return out2d[:M, :d_vocab].reshape(B, P, d_vocab)


if __name__ == "__main__":
    # Small synthetic config: batch=2, seq=8, d_model=32, d_vocab=256
    B, P, d_model, d_vocab = 2, 8, 32, 256

    key = jax.random.PRNGKey(0)
    k_tok, k_w, k_b = jax.random.split(key, 3)

    tokens = jax.random.normal(k_tok, (B, P, d_model), dtype=jnp.float32)
    W_U = jax.random.normal(k_w, (d_vocab, d_model), dtype=jnp.float32) * 0.02
    b_U = jax.random.normal(k_b, (d_vocab,), dtype=jnp.float32) * 0.01

    # --- f32 path: exact check against the einsum reference ---------------
    logits = unembed(tokens, W_U, b_U)
    logits = jax.block_until_ready(logits)
    ref = jnp.einsum("vm,bpm->bpv", W_U, tokens) + b_U
    assert logits.shape == (B, P, d_vocab)
    assert jnp.allclose(logits, ref, atol=1e-5, rtol=1e-5), "f32 mismatch vs reference"

    # --- bf16 path (HBM-bound production regime): f32 accumulation --------
    tokens_bf = tokens.astype(jnp.bfloat16)
    W_bf = W_U.astype(jnp.bfloat16)
    logits_bf = unembed(tokens_bf, W_bf, b_U)
    logits_bf = jax.block_until_ready(logits_bf)
    ref_bf = jnp.einsum("vm,bpm->bpv",
                        W_bf.astype(jnp.float32),
                        tokens_bf.astype(jnp.float32)) + b_U
    assert jnp.allclose(logits_bf, ref_bf, atol=1e-4, rtol=1e-4), "bf16 mismatch vs reference"

    # --- ragged-shape sanity check (pads M and d_vocab) --------------------
    B2, P2, dm2, dv2 = 1, 5, 32, 200
    t2 = jax.random.normal(k_tok, (B2, P2, dm2), dtype=jnp.float32)
    W2 = jax.random.normal(k_w, (dv2, dm2), dtype=jnp.float32) * 0.02
    b2 = jax.random.normal(k_b, (dv2,), dtype=jnp.float32) * 0.01
    out2 = jax.block_until_ready(unembed(t2, W2, b2))
    ref2 = jnp.einsum("vm,bpm->bpv", W2, t2) + b2
    assert jnp.allclose(out2, ref2, atol=1e-5, rtol=1e-5), "ragged mismatch vs reference"

    print("KERNEL_OK")
</pallas_src>

<mosaic_0001>
module attributes {stable_mosaic.version = 11 : i64} {
  func.func @_unembed_kernel(%arg0: i32, %arg1: i32, %arg2: memref<16x32xf32, #tpu.memory_space<vmem>>, %arg3: memref<256x32xf32, #tpu.memory_space<vmem>>, %arg4: memref<1x256xf32, #tpu.memory_space<vmem>>, %arg5: memref<16x256xf32, #tpu.memory_space<vmem>>) attributes {dimension_semantics = [#tpu.dimension_semantics<parallel>, #tpu.dimension_semantics<parallel>], iteration_bounds = array<i64: 1, 1>, scalar_prefetch = 0 : i64, scratch_operands = 0 : i64, tpu.core_type = #tpu.core_type<tc>, window_params = [{transform_indices = @transform_0, window_bounds = array<i64: 16, 32>}, {transform_indices = @transform_1, window_bounds = array<i64: 256, 32>}, {transform_indices = @transform_2, window_bounds = array<i64: 1, 256>}, {transform_indices = @transform_3, window_bounds = array<i64: 16, 256>}]} {
    %c0 = arith.constant 0 : index
    %c0_0 = arith.constant 0 : index
    %0 = vector.load %arg2[%c0, %c0_0] : memref<16x32xf32, #tpu.memory_space<vmem>>, vector<16x32xf32>
    %c0_1 = arith.constant 0 : index
    %c0_2 = arith.constant 0 : index
    %1 = vector.load %arg3[%c0_1, %c0_2] : memref<256x32xf32, #tpu.memory_space<vmem>>, vector<256x32xf32>
    %cst = arith.constant dense<0.000000e+00> : vector<16x256xf32>
    %2 = tpu.matmul %0, %1, %cst {dimension_numbers = #tpu.dot_dimension_numbers<[1], [1], [0], [0], [0, 0, 1, 0], [], []>} : vector<16x32xf32>, vector<256x32xf32>, vector<16x256xf32> -> vector<16x256xf32>
    %c0_3 = arith.constant 0 : index
    %c0_4 = arith.constant 0 : index
    %3 = vector.load %arg4[%c0_3, %c0_4] : memref<1x256xf32, #tpu.memory_space<vmem>>, vector<1x256xf32>
    %4 = vector.broadcast %3 : vector<1x256xf32> to vector<16x256xf32>
    %5 = arith.addf %2, %4 : vector<16x256xf32>
    %c0_5 = arith.constant 0 : index
    %c0_6 = arith.constant 0 : index
    %6 = vector.load %arg5[%c0_5, %c0_6] : memref<16x256xf32, #tpu.memory_space<vmem>>, vector<16x256xf32>
    tpu.vector_store %arg5[%c0_5, %c0_6], %5 {strides = array<i32>} : memref<16x256xf32, #tpu.memory_space<vmem>>, vector<16x256xf32>,
    return
  }
  func.func @transform_0(%arg0: i32, %arg1: i32) -> (i32, i32) {
    %c0_i32 = arith.constant 0 : i32
    %c0_i32_0 = arith.constant 0 : i32
    return %arg0, %c0_i32 : i32, i32
  }
  func.func @transform_1(%arg0: i32, %arg1: i32) -> (i32, i32) {
    %c0_i32 = arith.constant 0 : i32
    %c0_i32_0 = arith.constant 0 : i32
    return %arg1, %c0_i32 : i32, i32
  }
  func.func @transform_2(%arg0: i32, %arg1: i32) -> (i32, i32) {
    %c0_i32 = arith.constant 0 : i32
    %c0_i32_0 = arith.constant 0 : i32
    return %c0_i32, %arg1 : i32, i32
  }
  func.func @transform_3(%arg0: i32, %arg1: i32) -> (i32, i32) {
    %c0_i32 = arith.constant 0 : i32
    return %arg0, %arg1 : i32, i32
  }
}

</mosaic_0001>

<bundles_post_ra>
// kernel: tpu_custom_call.1
= control target key start
LH: loop header
LB: loop body
LE: loop exit
PB: predicated region body
PF: predicated region fallthrough
CT: control target
= control target key end

     0   :  { %vm55_vm0 = vcmask 261120   ;;  %s522_s0 = inlined_call_operand.vmem [shape: f32[16,32], index: 0, kind: input, shape index: {}]   ;;  %s523_s1 = inlined_call_operand.vmem [shape: f32[256,32], index: 1, kind: input, shape index: {}]   ;;  %s524_s2 = inlined_call_operand.vmem [shape: f32[1,256], index: 2, kind: input, shape index: {}]   ;;  %s525_s3 = inlined_call_operand.hbm [shape: f32[16,256], index: 3, kind: output, shape index: {}]  }
   0x1   :  { %v32_v0 = vld [vmem:[%s523_s1 + $0x78] sm:$0xff]  ;;  %v31_v2 = vld [vmem:[%s523_s1 + $0x70] sm:$0xff]  ;;  %v30_v4 = vld [vmem:[%s523_s1 + $0x68] sm:$0xff] }
   0x2   :  { %v48_v1 = vld [vmem:[%s523_s1 + $0xf8] sm:$0xff]  ;;  %262 = vmatpush.xpose.msk.msra.mxu2 %vm55_vm0, %v32_v0  ;;  %v47_v3 = vld [vmem:[%s523_s1 + $0xf0] sm:$0xff]  ;;  %226 = vmatpush.xpose.msk.msra.mxu0 %vm55_vm0, %v32_v0  ;;  %v46_v5 = vld [vmem:[%s523_s1 + $0xe8] sm:$0xff] }
   0x3   :  { %278 = vmatpush.xpose.msk.msra.mxu3 %vm55_vm0, %v48_v1  ;;  %244 = vmatpush.xpose.msk.msra.mxu1 %vm55_vm0, %v48_v1 }
   0x6   :  { %263 = vmatpush.xpose.msk.msra.mxu2 %vm55_vm0, %v31_v2  ;;  %227 = vmatpush.xpose.msk.msra.mxu0 %vm55_vm0, %v31_v2 }
   0x7   :  { %279 = vmatpush.xpose.msk.msra.mxu3 %vm55_vm0, %v47_v3  ;;  %245 = vmatpush.xpose.msk.msra.mxu1 %vm55_vm0, %v47_v3 }
   0x8   :  { %8 = vsyncpa [#allocation3], 0  ;;  %v29_v6 = vld [vmem:[%s523_s1 + $0x60] sm:$0xff]  ;;  %v28_v8 = vld [vmem:[%s523_s1 + $0x58] sm:$0xff]  ;;  %s214_s30 = sshll.u32 %s525_s3, 4  ;;  %s325_s4 = smov 16   ;;  %s215_s30 = int_to_ptr.hbm [resolvable:$true] %s214_s30 }
   0x9   :  { %v45_v7 = vld [vmem:[%s523_s1 + $0xe0] sm:$0xff]  ;;  %v44_v9 = vld [vmem:[%s523_s1 + $0xd8] sm:$0xff]  ;;  %v27_v10 = vld [vmem:[%s523_s1 + $0x50] sm:$0xff] }
   0xa   :  { %264 = vmatpush.xpose.msk.msra.mxu2 %vm55_vm0, %v30_v4  ;;  %228 = vmatpush.xpose.msk.msra.mxu0 %vm55_vm0, %v30_v4  ;;  %v43_v11 = vld [vmem:[%s523_s1 + $0xd0] sm:$0xff]  ;;  %v26_v12 = vld [vmem:[%s523_s1 + $0x48] sm:$0xff]  ;;  %v25_v14 = vld [vmem:[%s523_s1 + $0x40] sm:$0xff] }
   0xb   :  { %280 = vmatpush.xpose.msk.msra.mxu3 %vm55_vm0, %v46_v5  ;;  %246 = vmatpush.xpose.msk.msra.mxu1 %vm55_vm0, %v46_v5  ;;  %v42_v13 = vld [vmem:[%s523_s1 + $0xc8] sm:$0xff]  ;;  %v41_v15 = vld [vmem:[%s523_s1 + $0xc0] sm:$0xff]  ;;  %v24_v16 = vld [vmem:[%s523_s1 + $0x38] sm:$0xff] }
   0xc   :  { %v40_v17 = vld [vmem:[%s523_s1 + $0xb8] sm:$0xff]  ;;  %v23_v18 = vld [vmem:[%s523_s1 + $0x30] sm:$0xff]  ;;  %v22_v20 = vld [vmem:[%s523_s1 + $0x28] sm:$0xff] }
   0xd   :  { %v39_v19 = vld [vmem:[%s523_s1 + $0xb0] sm:$0xff]  ;;  %v38_v21 = vld [vmem:[%s523_s1 + $0xa8] sm:$0xff]  ;;  %v21_v22 = vld [vmem:[%s523_s1 + $0x20] sm:$0xff] }
   0xe   :  { %265 = vmatpush.xpose.msk.msra.mxu2 %vm55_vm0, %v29_v6  ;;  %229 = vmatpush.xpose.msk.msra.mxu0 %vm55_vm0, %v29_v6  ;;  %v37_v23 = vld [vmem:[%s523_s1 + $0xa0] sm:$0xff]  ;;  %v20_v24 = vld [vmem:[%s523_s1 + $0x18] sm:$0xff]  ;;  %v19_v26 = vld [vmem:[%s523_s1 + $0x10] sm:$0xff] }
   0xf   :  { %281 = vmatpush.xpose.msk.msra.mxu3 %vm55_vm0, %v45_v7  ;;  %247 = vmatpush.xpose.msk.msra.mxu1 %vm55_vm0, %v45_v7  ;;  %v36_v25 = vld [vmem:[%s523_s1 + $0x98] sm:$0xff]  ;;  %v35_v27 = vld [vmem:[%s523_s1 + $0x90] sm:$0xff]  ;;  %v18_v28 = vld [vmem:[%s523_s1 + $0x8] sm:$0xff] }
  0x10   :  { %v34_v29 = vld [vmem:[%s523_s1 + $0x88] sm:$0xff]  ;;  %v17_v30 = vld [vmem:[%s523_s1] sm:$0xff] }
  0x11   :  { %v33_v31 = vld [vmem:[%s523_s1 + $0x80] sm:$0xff]  ;;  %v16_v32 = vld [vmem:[%s522_s0 + $0x8] sm:$0xff] }
  0x12   :  { %266 = vmatpush.xpose.msk.msra.mxu2 %vm55_vm0, %v28_v8  ;;  %230 = vmatpush.xpose.msk.msra.mxu0 %vm55_vm0, %v28_v8  ;;  %v15_v33 = vld [vmem:[%s522_s0] sm:$0xff]  ;;  %s323_s0 = smov [#allocation2]  }
  0x13   :  { %282 = vmatpush.xpose.msk.msra.mxu3 %vm55_vm0, %v44_v9  ;;  %248 = vmatpush.xpose.msk.msra.mxu1 %vm55_vm0, %v44_v9  ;;  %v49_v34 = vld [vmem:[%s524_s2] sm:$0x3]  ;;  %s212_s27 = sshll.u32 %s323_s0, 4  ;;  %s324_s2 = smov 256   ;;  %s213_s27 = int_to_ptr.vmem [resolvable:$true] %s212_s27 }
  0x14   :  { %v51_v35 = vperm.slane %v49_v34, 0  ;;  %v52_v36 = vperm.slane %v49_v34, 1 }
  0x16   :  { %267 = vmatpush.xpose.msk.msra.mxu2 %vm55_vm0, %v27_v10  ;;  %231 = vmatpush.xpose.msk.msra.mxu0 %vm55_vm0, %v27_v10 }
  0x17   :  { %283 = vmatpush.xpose.msk.msra.mxu3 %vm55_vm0, %v43_v11  ;;  %249 = vmatpush.xpose.msk.msra.mxu1 %vm55_vm0, %v43_v11 }
  0x1a   :  { %268 = vmatpush.xpose.msk.msra.mxu2 %vm55_vm0, %v26_v12  ;;  %232 = vmatpush.xpose.msk.msra.mxu0 %vm55_vm0, %v26_v12 }
  0x1b   :  { %284 = vmatpush.xpose.msk.msra.mxu3 %vm55_vm0, %v42_v13  ;;  %250 = vmatpush.xpose.msk.msra.mxu1 %vm55_vm0, %v42_v13 }
  0x1e   :  { %269 = vmatpush.xpose.msk.msra.mxu2 %vm55_vm0, %v25_v14  ;;  %233 = vmatpush.xpose.msk.msra.mxu0 %vm55_vm0, %v25_v14 }
  0x1f   :  { %285 = vmatpush.xpose.msk.msra.mxu3 %vm55_vm0, %v41_v15  ;;  %251 = vmatpush.xpose.msk.msra.mxu1 %vm55_vm0, %v41_v15 }
  0x22   :  { %270 = vmatpush.xpose.msk.msra.mxu2 %vm55_vm0, %v24_v16  ;;  %234 = vmatpush.xpose.msk.msra.mxu0 %vm55_vm0, %v24_v16 }
  0x23   :  { %286 = vmatpush.xpose.msk.msra.mxu3 %vm55_vm0, %v40_v17  ;;  %252 = vmatpush.xpose.msk.msra.mxu1 %vm55_vm0, %v40_v17 }
  0x26   :  { %271 = vmatpush.xpose.msk.msra.mxu2 %vm55_vm0, %v23_v18  ;;  %235 = vmatpush.xpose.msk.msra.mxu0 %vm55_vm0, %v23_v18 }
  0x27   :  { %287 = vmatpush.xpose.msk.msra.mxu3 %vm55_vm0, %v39_v19  ;;  %253 = vmatpush.xpose.msk.msra.mxu1 %vm55_vm0, %v39_v19 }
  0x2a   :  { %272 = vmatpush.xpose.msk.msra.mxu2 %vm55_vm0, %v22_v20  ;;  %236 = vmatpush.xpose.msk.msra.mxu0 %vm55_vm0, %v22_v20 }
  0x2b   :  { %288 = vmatpush.xpose.msk.msra.mxu3 %vm55_vm0, %v38_v21  ;;  %254 = vmatpush.xpose.msk.msra.mxu1 %vm55_vm0, %v38_v21 }
  0x2e   :  { %273 = vmatpush.xpose.msk.msra.mxu2 %vm55_vm0, %v21_v22  ;;  %237 = vmatpush.xpose.msk.msra.mxu0 %vm55_vm0, %v21_v22 }
  0x2f   :  { %289 = vmatpush.xpose.msk.msra.mxu3 %vm55_vm0, %v37_v23  ;;  %255 = vmatpush.xpose.msk.msra.mxu1 %vm55_vm0, %v37_v23 }
  0x32   :  { %274 = vmatpush.xpose.msk.msra.mxu2 %vm55_vm0, %v20_v24  ;;  %238 = vmatpush.xpose.msk.msra.mxu0 %vm55_vm0, %v20_v24 }
  0x33   :  { %290 = vmatpush.xpose.msk.msra.mxu3 %vm55_vm0, %v36_v25  ;;  %256 = vmatpush.xpose.msk.msra.mxu1 %vm55_vm0, %v36_v25 }
  0x36   :  { %275 = vmatpush.xpose.msk.msra.mxu2 %vm55_vm0, %v19_v26  ;;  %239 = vmatpush.xpose.msk.msra.mxu0 %vm55_vm0, %v19_v26 }
  0x37   :  { %291 = vmatpush.xpose.msk.msra.mxu3 %vm55_vm0, %v35_v27  ;;  %257 = vmatpush.xpose.msk.msra.mxu1 %vm55_vm0, %v35_v27 }
  0x3a   :  { %276 = vmatpush.xpose.msk.msra.mxu2 %vm55_vm0, %v18_v28  ;;  %240 = vmatpush.xpose.msk.msra.mxu0 %vm55_vm0, %v18_v28 }
  0x3b   :  { %292 = vmatpush.xpose.msk.msra.mxu3 %vm55_vm0, %v34_v29  ;;  %258 = vmatpush.xpose.msk.msra.mxu1 %vm55_vm0, %v34_v29 }
  0x3e   :  { %277 = vmatpush.xpose.msk.msra.mxu2 %vm55_vm0, %v17_v30  ;;  %241 = vmatpush.xpose.msk.msra.mxu0 %vm55_vm0, %v17_v30 }
  0x3f   :  { %293 = vmatpush.xpose.msk.msra.mxu3 %vm55_vm0, %v33_v31  ;;  %259 = vmatpush.xpose.msk.msra.mxu1 %vm55_vm0, %v33_v31 }
  0x41   :  { %243 = vmatmul.msk.f32.vlgmr.msra.gmra.mxu2 %vm55_vm0, %v16_v32  ;;  %242 = vmatmul.msk.f32.vlgmr.msra.gmra.mxu0 %vm55_vm0, %v15_v33 }
  0x42   :  { %261 = vmatmul.msk.f32.vlgmr.msra.gmra.mxu3 %vm55_vm0, %v16_v32  ;;  %260 = vmatmul.msk.f32.vlgmr.msra.gmra.mxu1 %vm55_vm0, %v15_v33 }
  0xbe   :  { %v175_v37 = vpop.f32.mrf.mxu0 }
  0xbf   :  { %v198_v38 = vpop.f32.mrf.mxu1  ;;  %v176_v39 = vadd.f32 %v175_v37, %v51_v35 }
  0xc0   :  { %v199_v40 = vadd.f32 %v198_v38, %v52_v36 }
  0xc1   :  { %204 = vst [vmem:[#allocation2] sm:$0xff] %v176_v39 }
  0xc2   :  { %205 = vst [vmem:[#allocation2 + $0x8] sm:$0xff] %v199_v40 }
  0xc4   :  { %v178_v41 = vpop.f32.mrf.mxu2 }
  0xc5   :  { %v201_v42 = vpop.f32.mrf.mxu3  ;;  %v179_v43 = vadd.f32 %v178_v41, %v51_v35 }
  0xc6   :  { %v202_v44 = vadd.f32 %v201_v42, %v52_v36 }
  0xc7   :  { %206 = vst [vmem:[#allocation2 + $0x10] sm:$0xff] %v179_v43 }
  0xc8   :  { %207 = vst [vmem:[#allocation2 + $0x18] sm:$0xff] %v202_v44 }
  0xc9   :  { %220 = dma.vmem_to_hbm [thread:$0]  %s213_s27, 512, %s215_s30, [#allocation3], %s324_s2, %s324_s2, %s325_s4  }
  0xca   :  { %321 = dma.done.wait [#allocation3], 512  }
  0xcb   :  { %322 = vsyncadd [#allocation3], 4294966784 }
  0xcc   :  { %225 = vsyncpa [#allocation3], 1 }

</bundles_post_ra>
